<compile_context>
chip_gen: v5e
topology: v5e:2x2
jax: 0.10.0
libtpu: 0.0.40
codegen_flags: <defaults>
</compile_context>

<pallas_src>
import functools
import math

import jax
import jax.numpy as jnp
from jax import lax
from jax.experimental import pallas as pl
from jax.experimental.pallas import tpu as pltpu

_MASK_VALUE = -1e30                       # finite "minus infinity" for the causal mask
_RESIDENT_WEIGHT_BUDGET = 24 * 1024 * 1024  # bytes; above this, stream weights per head


def _self_attention_kernel(x_ref, wqkv_ref, bqkv_ref, wo_ref, bo_ref, o_ref,
                           acc_ref, *maybe_mask, causal, scale, dh, fuse_out,
                           weights_resident):
    h = pl.program_id(1)
    last_h = pl.num_programs(1) - 1
    f32 = jnp.float32

    mask_ref = maybe_mask[0] if causal else None

    # ---- per-batch init: zero the head accumulator / build the causal mask once ----
    if causal or (not fuse_out):
        @pl.when(h == 0)
        def _():
            if not fuse_out:
                acc_ref[...] = jnp.zeros_like(acc_ref)
            if causal:
                S = mask_ref.shape[0]
                row = lax.broadcasted_iota(jnp.int32, (S, S), 0)
                col = lax.broadcasted_iota(jnp.int32, (S, S), 1)
                mask_ref[...] = jnp.where(col > row, f32(_MASK_VALUE), f32(0.0))

    x = x_ref[0]                                  # (S, D), input dtype (f32 or bf16)
    dt = x.dtype

    # ---- fused per-head QKV projection: (S, D) @ (D, 3*dh), f32 accumulation ----
    if weights_resident:
        wqkv = wqkv_ref[h]                        # (D, 3*dh)
        bqkv = bqkv_ref[h]                        # (1, 3*dh)
    else:
        wqkv = wqkv_ref[0]                        # streamed per-head block
        bqkv = bqkv_ref[0]

    qkv = jnp.dot(x, wqkv, preferred_element_type=f32) + bqkv.astype(f32)   # (S, 3*dh)
    q = qkv[:, 0 * dh:1 * dh] * scale             # fold 1/sqrt(dh) into q (cheap axis)
    k = qkv[:, 1 * dh:2 * dh]
    v = qkv[:, 2 * dh:3 * dh]

    # ---- scores = q @ k^T without an in-kernel transpose of k ----
    s = lax.dot_general(q.astype(dt), k.astype(dt), (((1,), (1,)), ((), ())),
                        preferred_element_type=f32)                         # (S, S) f32
    if causal:
        s = s + mask_ref[...]                     # additive mask built once at h == 0

    # ---- numerically-stable softmax (f32); reciprocal on the EUP ----
    m = jnp.max(s, axis=-1, keepdims=True)
    p = jnp.exp(s - m)
    l = jnp.sum(p, axis=-1, keepdims=True)
    inv_l = pl.reciprocal(l, approx=True)
    inv_l = inv_l * (2.0 - l * inv_l)             # one Newton step -> ~f32 accuracy
    p = p * inv_l

    # ---- context for this head ----
    ctx = jnp.dot(p.astype(dt), v.astype(dt), preferred_element_type=f32)   # (S, dh)

    if fuse_out:
        # Write this head's context into its lane-aligned column slice; one full-depth
        # (S, D) @ (D, D) out_proj matmul at the last head.
        col0 = pl.multiple_of(h * dh, dh)
        acc_ref[:, pl.ds(col0, dh)] = ctx

        @pl.when(h == last_h)
        def _():
            out = jnp.dot(acc_ref[...].astype(dt), wo_ref[...],
                          preferred_element_type=f32)
            o_ref[0] = (out + bo_ref[...].astype(f32)).astype(o_ref.dtype)
    else:
        # Per-head out_proj contribution, accumulated in f32.
        wo = wo_ref[h] if weights_resident else wo_ref[0]                   # (dh, D)
        acc_ref[...] += jnp.dot(ctx.astype(dt), wo, preferred_element_type=f32)

        @pl.when(h == last_h)
        def _():
            o_ref[0] = (acc_ref[...] + bo_ref[...].astype(f32)).astype(o_ref.dtype)


def self_attention(x, w_in, b_in, w_out, b_out, *, n_heads, causal_mask=False,
                   weights_resident=None):
    B, S, D = x.shape
    H = n_heads
    dh = D // H
    itm = x.dtype.itemsize

    # ---- static layout / strategy choices (wrapper-side, outside the kernel) ----
    resident_weight_bytes = (D * 3 * D + 3 * D + D * D + D) * itm
    if weights_resident is None:
        weights_resident = resident_weight_bytes <= _RESIDENT_WEIGHT_BUDGET
    # Full-depth fused out_proj only when the context slice stores are lane aligned
    # and the full (D, D) w_out can stay resident.
    fuse_out = (dh % 128 == 0) and weights_resident

    # ---- head-major, QKV-fused weight layout (pure layout plumbing) ----
    w_r = w_in.reshape(D, 3, H, dh)                              # columns = [q|k|v], head-blocked
    w_qkv = jnp.transpose(w_r, (2, 0, 1, 3)).reshape(H, D, 3 * dh)   # (H, D, 3*dh)
    b_r = b_in.reshape(3, H, dh)
    b_qkv = jnp.transpose(b_r, (1, 0, 2)).reshape(H, 1, 3 * dh)      # (H, 1, 3*dh)

    if fuse_out:
        wo_arr = w_out                                           # (D, D), used whole
        wo_spec = pl.BlockSpec((D, D), lambda b, h: (0, 0),
                               pipeline_mode=pl.Buffered(1))
    else:
        wo_arr = w_out.reshape(H, dh, D)                         # per-head rows of w_out
        if weights_resident:
            wo_spec = pl.BlockSpec((H, dh, D), lambda b, h: (0, 0, 0),
                                   pipeline_mode=pl.Buffered(1))
        else:
            wo_spec = pl.BlockSpec((1, dh, D), lambda b, h: (h, 0, 0))

    if weights_resident:
        wqkv_spec = pl.BlockSpec((H, D, 3 * dh), lambda b, h: (0, 0, 0),
                                 pipeline_mode=pl.Buffered(1))
        bqkv_spec = pl.BlockSpec((H, 1, 3 * dh), lambda b, h: (0, 0, 0),
                                 pipeline_mode=pl.Buffered(1))
    else:
        wqkv_spec = pl.BlockSpec((1, D, 3 * dh), lambda b, h: (h, 0, 0))
        bqkv_spec = pl.BlockSpec((1, 1, 3 * dh), lambda b, h: (h, 0, 0))

    bo_spec = pl.BlockSpec((1, D), lambda b, h: (0, 0), pipeline_mode=pl.Buffered(1))

    # ---- VMEM scratch: f32 accumulator (+ causal mask built once per batch) ----
    scratch_shapes = [pltpu.VMEM((S, D), jnp.float32)]
    if causal_mask:
        scratch_shapes.append(pltpu.VMEM((S, S), jnp.float32))

    kernel = functools.partial(_self_attention_kernel,
                               causal=causal_mask, scale=1.0 / math.sqrt(dh),
                               dh=dh, fuse_out=fuse_out,
                               weights_resident=weights_resident)

    # ---- advisory cost estimate (includes output write + weight re-streams) ----
    flops = 2 * B * S * D * 3 * D + 4 * B * H * S * S * dh + 2 * B * S * D * D
    weight_elems = D * 3 * D + 3 * D + D * D + D
    weight_reads = 1 if weights_resident else B
    bytes_accessed = int((2 * B * S * D + weight_reads * weight_elems) * itm)
    cost = pl.CostEstimate(flops=flops, transcendentals=B * H * S * S,
                           bytes_accessed=bytes_accessed)

    # ---- explicit VMEM limit from the real footprint (with headroom, <= 60 MiB) ----
    x_blk = 2 * S * D * itm                      # double-buffered input block
    o_blk = 2 * S * D * itm                      # output block
    if weights_resident:
        wqkv_b = (H * D * 3 * dh + H * 3 * dh) * itm     # Buffered(1), resident
    else:
        wqkv_b = 2 * (D * 3 * dh + 3 * dh) * itm         # per-head, double-buffered
    if fuse_out:
        wo_b = D * D * itm
    else:
        wo_b = (H * dh * D if weights_resident else 2 * dh * D) * itm
    acc_b = S * D * 4
    mask_b = S * S * 4 if causal_mask else 0
    interm_b = (S * 3 * dh + 2 * S * S + 2 * S * D) * 4  # qkv, scores/probs, ctx/out f32
    footprint = x_blk + o_blk + wqkv_b + wo_b + D * itm + acc_b + mask_b + interm_b
    vmem_limit = int(min(max(2 * footprint, 32 * 1024 * 1024), 60 * 1024 * 1024))

    grid_spec = pltpu.PrefetchScalarGridSpec(
        num_scalar_prefetch=0,
        grid=(B, H),
        in_specs=[
            pl.BlockSpec((1, S, D), lambda b, h: (b, 0, 0)),     # x (resident across h)
            wqkv_spec,                                           # fused QKV weights
            bqkv_spec,                                           # fused QKV biases
            wo_spec,                                             # out_proj weights
            bo_spec,                                             # out_proj bias
        ],
        out_specs=pl.BlockSpec((1, S, D), lambda b, h: (b, 0, 0)),
        scratch_shapes=scratch_shapes,
    )

    return pl.pallas_call(
        kernel,
        out_shape=jax.ShapeDtypeStruct((B, S, D), x.dtype),
        grid_spec=grid_spec,
        compiler_params=pltpu.CompilerParams(
            dimension_semantics=("parallel", "arbitrary"),
            vmem_limit_bytes=vmem_limit),
        cost_estimate=cost,
    )(x, w_qkv, b_qkv, wo_arr, b_out)


def self_attention_ref(x, w_in, b_in, w_out, b_out, *, n_heads, causal_mask=False):
    """Pure-JAX reference mirroring the PyTorch forward."""
    B, S, D = x.shape
    dh = D // n_heads
    qkv = x.astype(jnp.float32) @ w_in.astype(jnp.float32) + b_in.astype(jnp.float32)
    q, k, v = jnp.split(qkv, 3, axis=-1)

    def heads(t):  # (B, S, D) -> (B, H, S, dh)
        return t.reshape(B, S, n_heads, dh).transpose(0, 2, 1, 3)

    q, k, v = heads(q), heads(k), heads(v)
    w = jnp.einsum('bhqd,bhkd->bhqk', q, k)
    if causal_mask:
        tri = jnp.triu(jnp.ones((S, S), dtype=bool), k=1)
        w = jnp.where(tri[None, None], -jnp.inf, w)
    w = w / math.sqrt(dh)
    w = jax.nn.softmax(w, axis=-1)
    out = jnp.einsum('bhqk,bhkd->bhqd', w, v)
    out = out.transpose(0, 2, 1, 3).reshape(B, S, D)
    return out @ w_out.astype(jnp.float32) + b_out.astype(jnp.float32)


if __name__ == "__main__":
    def make_params(key, D):
        kx_, kwi, kbi, kwo, kbo = jax.random.split(key, 5)
        w_in = jax.random.normal(kwi, (D, 3 * D), dtype=jnp.float32) / math.sqrt(D)
        b_in = jax.random.normal(kbi, (1, 3 * D), dtype=jnp.float32) * 0.01
        w_out = jax.random.normal(kwo, (D, D), dtype=jnp.float32) / math.sqrt(D)
        b_out = jax.random.normal(kbo, (1, D), dtype=jnp.float32) * 0.01
        return kx_, w_in, b_in, w_out, b_out

    # Tolerances are loose-but-meaningful: MXU matmuls (kernel and XLA reference) may
    # use bf16-pass accumulation for f32 operands; layout/mask/bias bugs would be O(1).
    ATOL = RTOL = 2e-2

    # Case 1: small D (dh=8) -> resident weights, per-head out_proj accumulation path.
    B, S, D, H = 2, 8, 32, 4
    kx, w_in, b_in, w_out, b_out = make_params(jax.random.PRNGKey(0), D)
    x = jax.random.normal(kx, (B, S, D), dtype=jnp.float32)
    for causal in (False, True):
        out = jax.block_until_ready(
            self_attention(x, w_in, b_in, w_out, b_out, n_heads=H, causal_mask=causal))
        ref = self_attention_ref(x, w_in, b_in, w_out, b_out, n_heads=H, causal_mask=causal)
        assert out.shape == (B, S, D)
        assert jnp.allclose(out, ref, atol=ATOL, rtol=RTOL), f"mismatch (causal={causal})"

    # Case 2: force the streamed per-head weight DMA path (large-D fallback).
    out = jax.block_until_ready(
        self_attention(x, w_in, b_in, w_out, b_out, n_heads=H, causal_mask=True,
                       weights_resident=False))
    ref = self_attention_ref(x, w_in, b_in, w_out, b_out, n_heads=H, causal_mask=True)
    assert jnp.allclose(out, ref, atol=ATOL, rtol=RTOL), "mismatch (streamed weights)"

    # Case 3: dh == 128 -> fused full-depth (S,D)@(D,D) out_proj path.
    B2, S2, D2, H2 = 2, 8, 256, 2
    kx2, w_in2, b_in2, w_out2, b_out2 = make_params(jax.random.PRNGKey(1), D2)
    x2 = jax.random.normal(kx2, (B2, S2, D2), dtype=jnp.float32)
    out2 = jax.block_until_ready(
        self_attention(x2, w_in2, b_in2, w_out2, b_out2, n_heads=H2, causal_mask=True))
    ref2 = self_attention_ref(x2, w_in2, b_in2, w_out2, b_out2, n_heads=H2, causal_mask=True)
    assert jnp.allclose(out2, ref2, atol=ATOL, rtol=RTOL), "mismatch (fused out_proj)"

    # Case 4: bf16 operands (bf16 MXU path, f32 accumulation / softmax) vs f32 reference.
    out_bf = jax.block_until_ready(
        self_attention(x.astype(jnp.bfloat16), w_in.astype(jnp.bfloat16),
                       b_in.astype(jnp.bfloat16), w_out.astype(jnp.bfloat16),
                       b_out.astype(jnp.bfloat16), n_heads=H, causal_mask=True))
    ref = self_attention_ref(x, w_in, b_in, w_out, b_out, n_heads=H, causal_mask=True)
    assert jnp.allclose(out_bf.astype(jnp.float32), ref, atol=1.5e-1, rtol=1.5e-1), "bf16 mismatch"

    print("KERNEL_OK")
</pallas_src>

<mosaic_0001>
module attributes {stable_mosaic.version = 11 : i64} {
  func.func @_self_attention_kernel(%arg0: i32, %arg1: i32, %arg2: memref<1x8x32xf32, #tpu.memory_space<vmem>>, %arg3: memref<4x32x24xf32, #tpu.memory_space<vmem>>, %arg4: memref<4x1x24xf32, #tpu.memory_space<vmem>>, %arg5: memref<4x8x32xf32, #tpu.memory_space<vmem>>, %arg6: memref<1x32xf32, #tpu.memory_space<vmem>>, %arg7: memref<1x8x32xf32, #tpu.memory_space<vmem>>, %arg8: memref<8x32xf32, #tpu.memory_space<vmem>>) attributes {dimension_semantics = [#tpu.dimension_semantics<parallel>, #tpu.dimension_semantics<arbitrary>], iteration_bounds = array<i64: 2, 4>, scalar_prefetch = 0 : i64, scratch_operands = 1 : i64, tpu.core_type = #tpu.core_type<tc>, window_params = [{transform_indices = @transform_0, window_bounds = array<i64: 1, 8, 32>}, {pipeline_mode = #tpu.pipeline_mode<synchronous>, transform_indices = @transform_1, window_bounds = array<i64: 4, 32, 24>}, {pipeline_mode = #tpu.pipeline_mode<synchronous>, transform_indices = @transform_2, window_bounds = array<i64: 4, 1, 24>}, {pipeline_mode = #tpu.pipeline_mode<synchronous>, transform_indices = @transform_3, window_bounds = array<i64: 4, 8, 32>}, {pipeline_mode = #tpu.pipeline_mode<synchronous>, transform_indices = @transform_4, window_bounds = array<i64: 1, 32>}, {transform_indices = @transform_5, window_bounds = array<i64: 1, 8, 32>}]} {
    %c0_i32 = arith.constant 0 : i32
    %0 = arith.cmpi eq, %arg1, %c0_i32 : i32
    %1 = arith.extui %0 : i1 to i32
    %c0_i32_0 = arith.constant 0 : i32
    %2 = arith.cmpi ne, %1, %c0_i32_0 : i32
    scf.if %2 {
      %cst_21 = arith.constant 0.000000e+00 : f32
      %45 = vector.broadcast %cst_21 : f32 to vector<8x32xf32>
      %c0_22 = arith.constant 0 : index
      %c0_23 = arith.constant 0 : index
      %46 = vector.load %arg8[%c0_22, %c0_23] : memref<8x32xf32, #tpu.memory_space<vmem>>, vector<8x32xf32>
      tpu.vector_store %arg8[%c0_22, %c0_23], %45 {strides = array<i32>} : memref<8x32xf32, #tpu.memory_space<vmem>>, vector<8x32xf32>,
    } else {
    }
    %c0 = arith.constant 0 : index
    %c0_1 = arith.constant 0 : index
    %c0_2 = arith.constant 0 : index
    %3 = vector.load %arg2[%c0, %c0_1, %c0_2] : memref<1x8x32xf32, #tpu.memory_space<vmem>>, vector<1x8x32xf32>
    %4 = vector.shape_cast %3 : vector<1x8x32xf32> to vector<8x32xf32>
    %5 = arith.index_cast %arg1 : i32 to index
    %c0_3 = arith.constant 0 : index
    %c0_4 = arith.constant 0 : index
    %6 = vector.load %arg3[%5, %c0_3, %c0_4] : memref<4x32x24xf32, #tpu.memory_space<vmem>>, vector<1x32x24xf32>
    %7 = vector.shape_cast %6 : vector<1x32x24xf32> to vector<32x24xf32>
    %8 = arith.index_cast %arg1 : i32 to index
    %c0_5 = arith.constant 0 : index
    %c0_6 = arith.constant 0 : index
    %9 = vector.load %arg4[%8, %c0_5, %c0_6] : memref<4x1x24xf32, #tpu.memory_space<vmem>>, vector<1x1x24xf32>
    %10 = vector.shape_cast %9 : vector<1x1x24xf32> to vector<1x24xf32>
    %cst = arith.constant dense<0.000000e+00> : vector<8x24xf32>
    %11 = tpu.matmul %4, %7, %cst {dimension_numbers = #tpu.dot_dimension_numbers<[1], [0], [0], [1], [0, 0, 1, 1], [], []>} : vector<8x32xf32>, vector<32x24xf32>, vector<8x24xf32> -> vector<8x24xf32>
    %12 = vector.broadcast %10 : vector<1x24xf32> to vector<8x24xf32>
    %13 = arith.addf %11, %12 : vector<8x24xf32>
    %14 = vector.extract_strided_slice %13 {offsets = [0, 0], sizes = [8, 8], strides = [1, 1]} : vector<8x24xf32> to vector<8x8xf32>
    %cst_7 = arith.constant 0.353553385 : f32
    %15 = vector.broadcast %cst_7 : f32 to vector<8x8xf32>
    %16 = arith.mulf %14, %15 : vector<8x8xf32>
    %17 = vector.extract_strided_slice %13 {offsets = [0, 8], sizes = [8, 8], strides = [1, 1]} : vector<8x24xf32> to vector<8x8xf32>
    %18 = vector.extract_strided_slice %13 {offsets = [0, 16], sizes = [8, 8], strides = [1, 1]} : vector<8x24xf32> to vector<8x8xf32>
    %cst_8 = arith.constant dense<0.000000e+00> : vector<8x8xf32>
    %19 = tpu.matmul %16, %17, %cst_8 {dimension_numbers = #tpu.dot_dimension_numbers<[1], [1], [0], [0], [0, 0, 1, 0], [], []>} : vector<8x8xf32>, vector<8x8xf32>, vector<8x8xf32> -> vector<8x8xf32>
    %cst_9 = arith.constant dense<0xFF800000> : vector<8xf32>
    %20 = vector.multi_reduction <maximumf>, %19, %cst_9 [1] : vector<8x8xf32> to vector<8xf32>
    %21 = vector.shape_cast %20 : vector<8xf32> to vector<8x1xf32>
    %22 = vector.broadcast %21 : vector<8x1xf32> to vector<8x8xf32>
    %23 = arith.subf %19, %22 : vector<8x8xf32>
    %24 = math.exp %23 : vector<8x8xf32>
    %cst_10 = arith.constant dense<0.000000e+00> : vector<8xf32>
    %25 = vector.multi_reduction <add>, %24, %cst_10 [1] : vector<8x8xf32> to vector<8xf32>
    %26 = vector.shape_cast %25 : vector<8xf32> to vector<8x1xf32>
    %27 = tpu.reciprocal %26 {approx = true} : vector<8x1xf32> -> vector<8x1xf32>
    %28 = arith.mulf %26, %27 : vector<8x1xf32>
    %cst_11 = arith.constant 2.000000e+00 : f32
    %29 = vector.broadcast %cst_11 : f32 to vector<8x1xf32>
    %30 = arith.subf %29, %28 : vector<8x1xf32>
    %31 = arith.mulf %27, %30 : vector<8x1xf32>
    %32 = vector.broadcast %31 : vector<8x1xf32> to vector<8x8xf32>
    %33 = arith.mulf %24, %32 : vector<8x8xf32>
    %cst_12 = arith.constant dense<0.000000e+00> : vector<8x8xf32>
    %34 = tpu.matmul %33, %18, %cst_12 {dimension_numbers = #tpu.dot_dimension_numbers<[1], [0], [0], [1], [0, 0, 1, 1], [], []>} : vector<8x8xf32>, vector<8x8xf32>, vector<8x8xf32> -> vector<8x8xf32>
    %35 = arith.index_cast %arg1 : i32 to index
    %c0_13 = arith.constant 0 : index
    %c0_14 = arith.constant 0 : index
    %36 = vector.load %arg5[%35, %c0_13, %c0_14] : memref<4x8x32xf32, #tpu.memory_space<vmem>>, vector<1x8x32xf32>
    %37 = vector.shape_cast %36 : vector<1x8x32xf32> to vector<8x32xf32>
    %c0_15 = arith.constant 0 : index
    %c0_16 = arith.constant 0 : index
    %38 = vector.load %arg8[%c0_15, %c0_16] : memref<8x32xf32, #tpu.memory_space<vmem>>, vector<8x32xf32>
    %cst_17 = arith.constant dense<0.000000e+00> : vector<8x32xf32>
    %39 = tpu.matmul %34, %37, %cst_17 {dimension_numbers = #tpu.dot_dimension_numbers<[1], [0], [0], [1], [0, 0, 1, 1], [], []>} : vector<8x8xf32>, vector<8x32xf32>, vector<8x32xf32> -> vector<8x32xf32>
    %40 = arith.addf %38, %39 : vector<8x32xf32>
    %c0_18 = arith.constant 0 : index
    %c0_19 = arith.constant 0 : index
    %41 = vector.load %arg8[%c0_18, %c0_19] : memref<8x32xf32, #tpu.memory_space<vmem>>, vector<8x32xf32>
    tpu.vector_store %arg8[%c0_18, %c0_19], %40 {strides = array<i32>} : memref<8x32xf32, #tpu.memory_space<vmem>>, vector<8x32xf32>,
    %c3_i32 = arith.constant 3 : i32
    %42 = arith.cmpi eq, %arg1, %c3_i32 : i32
    %43 = arith.extui %42 : i1 to i32
    %c0_i32_20 = arith.constant 0 : i32
    %44 = arith.cmpi ne, %43, %c0_i32_20 : i32
    scf.if %44 {
      %c0_21 = arith.constant 0 : index
      %c0_22 = arith.constant 0 : index
      %45 = vector.load %arg8[%c0_21, %c0_22] : memref<8x32xf32, #tpu.memory_space<vmem>>, vector<8x32xf32>
      %c0_23 = arith.constant 0 : index
      %c0_24 = arith.constant 0 : index
      %46 = vector.load %arg6[%c0_23, %c0_24] : memref<1x32xf32, #tpu.memory_space<vmem>>, vector<1x32xf32>
      %47 = vector.broadcast %46 : vector<1x32xf32> to vector<8x32xf32>
      %48 = arith.addf %45, %47 : vector<8x32xf32>
      %c0_25 = arith.constant 0 : index
      %c0_26 = arith.constant 0 : index
      %c0_27 = arith.constant 0 : index
      %49 = vector.load %arg7[%c0_25, %c0_26, %c0_27] : memref<1x8x32xf32, #tpu.memory_space<vmem>>, vector<1x8x32xf32>
      %50 = vector.shape_cast %49 : vector<1x8x32xf32> to vector<8x32xf32>
      %51 = vector.shape_cast %48 : vector<8x32xf32> to vector<1x8x32xf32>
      tpu.vector_store %arg7[%c0_25, %c0_26, %c0_27], %51 {strides = array<i32>} : memref<1x8x32xf32, #tpu.memory_space<vmem>>, vector<1x8x32xf32>,
    } else {
    }
    return
  }
  func.func @transform_0(%arg0: i32, %arg1: i32) -> (i32, i32, i32) {
    %c0_i32 = arith.constant 0 : i32
    %c0_i32_0 = arith.constant 0 : i32
    %c0_i32_1 = arith.constant 0 : i32
    return %arg0, %c0_i32, %c0_i32_0 : i32, i32, i32
  }
  func.func @transform_1(%arg0: i32, %arg1: i32) -> (i32, i32, i32) {
    %c0_i32 = arith.constant 0 : i32
    %c0_i32_0 = arith.constant 0 : i32
    %c0_i32_1 = arith.constant 0 : i32
    %c0_i32_2 = arith.constant 0 : i32
    return %c0_i32, %c0_i32_0, %c0_i32_1 : i32, i32, i32
  }
  func.func @transform_2(%arg0: i32, %arg1: i32) -> (i32, i32, i32) {
    %c0_i32 = arith.constant 0 : i32
    %c0_i32_0 = arith.constant 0 : i32
    %c0_i32_1 = arith.constant 0 : i32
    %c0_i32_2 = arith.constant 0 : i32
    return %c0_i32, %c0_i32_0, %c0_i32_1 : i32, i32, i32
  }
  func.func @transform_3(%arg0: i32, %arg1: i32) -> (i32, i32, i32) {
    %c0_i32 = arith.constant 0 : i32
    %c0_i32_0 = arith.constant 0 : i32
    %c0_i32_1 = arith.constant 0 : i32
    %c0_i32_2 = arith.constant 0 : i32
    return %c0_i32, %c0_i32_0, %c0_i32_1 : i32, i32, i32
  }
  func.func @transform_4(%arg0: i32, %arg1: i32) -> (i32, i32) {
    %c0_i32 = arith.constant 0 : i32
    %c0_i32_0 = arith.constant 0 : i32
    %c0_i32_1 = arith.constant 0 : i32
    return %c0_i32, %c0_i32_0 : i32, i32
  }
  func.func @transform_5(%arg0: i32, %arg1: i32) -> (i32, i32, i32) {
    %c0_i32 = arith.constant 0 : i32
    %c0_i32_0 = arith.constant 0 : i32
    %c0_i32_1 = arith.constant 0 : i32
    return %arg0, %c0_i32, %c0_i32_0 : i32, i32, i32
  }
}

</mosaic_0001>

<bundles_post_ra>
// kernel: tpu_custom_call.1
= control target key start
LH: loop header
LB: loop body
LE: loop exit
PB: predicated region body
PF: predicated region fallthrough
CT: control target
= control target key end

     0   :  { %s858_s0 = inlined_call_operand.vmem [shape: f32[2,8,32], index: 0, kind: input, shape index: {}]   ;;  %s859_s1 = inlined_call_operand.vmem [shape: f32[4,32,24], index: 1, kind: input, shape index: {}]   ;;  %s860_s2 = inlined_call_operand.vmem [shape: f32[4,1,24], index: 2, kind: input, shape index: {}]   ;;  %s861_s3 = inlined_call_operand.vmem [shape: f32[4,8,32], index: 3, kind: input, shape index: {}]   ;;  %s862_s4 = inlined_call_operand.vmem [shape: f32[1,32], index: 4, kind: input, shape index: {}]   ;;  %s863_s5 = inlined_call_operand.hbm [shape: f32[2,8,32], index: 5, kind: output, shape index: {}]  }
   0x1   :  { %865 = sst [smem:[#allocation6_spill]] %s858_s0 }
   0x2   :  { %10 = vsyncpa [#allocation4], 0 }
   0x3   :  { %12 = vsyncpa [#allocation4 + $0x1], 0  ;;  %s704_s18 = smov 0   ;;  %s706_s19 = smov 0  }
   0x4   :  { %s708_s20 = smov 0   ;;  %s710_s21 = smov 0  }
   0x5   :  { %s712_s22 = smov 0   ;;  %s714_s23 = smov 0  }
   0x6   :  { %s716_s24 = smov 0   ;;  %s718_s25 = smov 0  }
   0x7 LB: > { %s475_s26 = sadd.s32 4294967295, %s669_s25   ;;  %s476_s27 = sadd.s32 4294967294, %s669_s25   ;;  %s669_s25 = sphi %s718_s25, %s18_s25   ;;  %s665_s24 = sphi %s716_s24, %s876_s24   ;;  %s661_s23 = sphi %s714_s23, %s875_s23   ;;  %s657_s22 = sphi %s712_s22, %s874_s22   ;;  %s653_s21 = sphi %s710_s21, %s873_s21   ;;  %s649_s20 = sphi %s708_s20, %s872_s20   ;;  %s645_s19 = sphi %s706_s19, %s871_s19   ;;  %s641_s18 = sphi %s704_s18, %s870_s18  }
   0x8   : > { %s27_s28 = sadd.s32 1, %s661_s23  ;;  %s30_s29 = sadd.s32 1, %s665_s24 }
   0x9   : > { %p28_p0 = scmp.ge.s32.totalorder %s27_s28, 4  ;;  %p157_p1 = scmp.ne.s32.totalorder %s649_s20, %s645_s19 }
   0xa   : > { %p158_p2 = scmp.eq.s32.totalorder %s475_s26, 7  ;;  %p163_p4 = scmp.ne.s32.totalorder %s645_s19, %s641_s18 }
   0xb   : > { %s878_s28 = smov (%p28_p0, %s27_s28), 0  ;;  %s880_s29 = smov (!%p28_p0, %s30_s29), %s665_s24 }
   0xc   : > { %p753_p3 = por %p158_p2, %p157_p1  ;;  %p32_p5 = scmp.ge.s32.totalorder %s880_s29, 2 }
   0xd   : > { %p164_p6 = scmp.eq.s32.totalorder %s476_s27, 7  ;;  %p479_p7 = scmp.ge.s32.totalorder %s669_s25, 1 }
   0xe   : > { %p201_p8 = scmp.lt.s32.totalorder %s669_s25, 9  ;;  %s882_s29 = smov (%p32_p5, %s880_s29), 0 }
   0xf   : > { %p763_p9 = por %p164_p6, %p163_p4  ;;  %s144_s7 = ssub.s32 %s665_s24, %s882_s29 }
  0x10   : > { %p202_p10 = pnand %p479_p7, %p201_p8  ;;  %s147_s8 = sadd.s32 1, %s649_s20 }
  0x11   : > { %p145_p11 = scmp.eq.s32.totalorder %s144_s7, 0  ;;  %s864_s10 = sand.u32 (!%p202_p10), 1, %s645_s19  }
  0x12   : > { %205 = sbr.rel (%p202_p10) target bundleno = 975 (0x3cf), region = 40  ;;  %p228_p12 = scmp.lt.s32.totalorder (!%p202_p10), %s657_s22, 1 }
  0x13   : > { %s771_s9 = scalar_select %p145_p11, %s649_s20, %s147_s8  }
  0x14   : > { %s777_s11 = sshll.u32 (!%p202_p10), %s864_s10, 3  ;;  %s868_s0 = sld [smem:[#allocation6_spill]] (!%p202_p10) }
  0x15   : > { %s227_s17 = scalar_lea.vmem (!%p202_p10), [#allocation3], %s777_s11  ;;  %p482_p13 = scmp.ne.s32.totalorder (!%p202_p10), %s653_s21, 0 }
  0x17   : > { %s229_s12 = scalar_select %p228_p12, %s657_s22, 1 }
  0x18   : > { %235 = sbr.rel (%p482_p13) target bundleno = 31 (0x1f), region = 44 }
  0x19   : > { %s481_s13 = sshll.u32 %s229_s12, 3 }
  0x1a   : > { %s231_s16 = scalar_lea.vmem %s868_s0, %s481_s13 }
  0x1d   : > { %vm236_vm0 = vcmask 261120   ;;  %v671_v0 = vmov 0.0  }
  0x1e   : > { %237 = vst.msk [vmem:[#allocation2] sm:$0xff] %vm236_vm0, %v671_v0 }
  0x1f PF: > { %s483_s26 = sshll.u32 %s653_s21, 5  ;;  %s245_s8 = scalar_lea.vmem %s860_s2, %s653_s21  ;;  %v238_v5 = vld [vmem:[%s231_s16] sm:$0xff]  ;;  %vm250_vm1 = vcmask 261120   ;;  %vm278_vm2 = vcmask 64512  }
  0x20   : > { %s240_s14 = scalar_lea.vmem %s859_s1, %s483_s26  ;;  %v569_v6 = vld [vmem:[%s245_s8] ss:$0 sm:$0xff]  ;;  %s672_s13 = smov 120  }
  0x21   : > { %v244_v1 = vld [vmem:[%s240_s14 + $0x18] sm:$0xff]  ;;  %v243_v2 = vld [vmem:[%s240_s14 + $0x10] sm:$0xff]  ;;  %v242_v3 = vld [vmem:[%s240_s14 + $0x8] sm:$0xff]  ;;  %s673_s10 = smov 112   ;;  %s488_s15 = sshll.u32 %s653_s21, 3 }
  0x22   : > { %266 = vmatpush.msra.mxu0 %v244_v1  ;;  %v241_v4 = vld [vmem:[%s240_s14] sm:$0xff]  ;;  %s345_s27 = scalar_lea.vmem %s861_s3, %s488_s15  ;;  %p490_p0 = scmp.ne.s32.totalorder %s653_s21, 3 }
  0x23   : > { %v346_v25 = vld [vmem:[%s345_s27] sm:$0xff] }
  0x24   : > { %267 = vmatpush.msra.mxu0 %v243_v2  ;;  %366 = vmatpush.msra.mxu3 %v346_v25 }
  0x25   : > { %v347_v27 = vld [vmem:[#allocation2] sm:$0xff] }
  0x26   : > { %268 = vmatpush.msra.mxu0 %v242_v3 }
  0x28   : > { %269 = vmatpush.msra.mxu0 %v241_v4 }
  0x29   : > { %484 = vmatmul.msk.f32.vlgmr.msra.gmra.mxu0 %vm250_vm1, %v238_v5 }
  0xa6   : > { %v271_v7 = vpop.f32.mrf.mxu0 }
  0xa7   : > { %v272_v8 = vadd.f32 %v569_v6, %v271_v7 }
  0xa9   : > { %276 = vrot.lane.b32.xlu0 %v272_v8, %s672_s13  ;;  %v274_v10 = vmul.f32 0.35355338, %v272_v8 }
 0x11b   : > { %v277_v9 = vpop.permute.xlu0 %276 }
 0x11c   : > { %485 = vmatpush.xpose.msk.msra.mxu1 %vm278_vm2, %v277_v9 }
 0x11f   : > { %486 = vmatmul.msk.f32.vlgmr.msra.gmra.mxu1 %vm278_vm2, %v274_v10 }
 0x19c   : > { %v301_v11 = vpop.f32.mrf.mxu1 }
 0x19d   : > { %v304_v12 = vsel %vm278_vm2, %v301_v11, -inf }
 0x19e   : > { %305 = vmax.xlane.f32.xlu0 %v304_v12 }
 0x211   : > { %v306_v13 = vpop.xlane.xlu0 %305 }
 0x212   : > { %v307_v14 = vsub.f32 %v301_v11, %v306_v13 }
 0x214   : > { %v308_v15 = vmul.f32 1.442695, %v307_v14 }
 0x216   : > { %570 = vpow2.f32 %v308_v15 }
 0x21c   : > { %v571_v16 = vpop.eup %570 }
 0x21d   : > { %v310_v17 = vsel %vm278_vm2, %v571_v16, 0.0 }
 0x21e   : > { %311 = vadd.xlane.f32.xlu1 %v310_v17 }
 0x237   : > { %318 = vrot.lane.b32.xlu1 %v272_v8, %s673_s10 }
 0x291   : > { %v312_v18 = vpop.xlane.xlu1 %311 }
 0x292   : > { %572 = vrcp.f32 %v312_v18 }
 0x298   : > { %v573_v19 = vpop.eup %572 }
 0x299   : > { %v314_v20 = vmul.f32 %v573_v19, %v312_v18 }
 0x29b   : > { %v315_v21 = vsub.f32 2.0, %v314_v20 }
 0x29d   : > { %v316_v22 = vmul.f32 %v573_v19, %v315_v21 }
 0x29f   : > { %v317_v24 = vmul.f32 %v571_v16, %v316_v22 }
 0x2a9   : > { %v319_v23 = vpop.permute.xlu1 %318 }
 0x2aa   : > { %339 = vmatpush.msra.mxu2 %v319_v23 }
 0x2ab   : > { %487 = vmatmul.msk.f32.vlgmr.msra.gmra.mxu2 %vm278_vm2, %v317_v24 }
 0x32e   : > { %v341_v26 = vpop.f32.mrf.mxu2 }
 0x32f   : > { %489 = vmatmul.msk.f32.vlgmr.msra.gmra.mxu3 %vm278_vm2, %v341_v26 }
 0x3b1   : > { %376 = sbr.rel (%p490_p0) target bundleno = 960 (0x3c0), region = 48 }
 0x3b2   : > { %v368_v28 = vpop.f32.mrf.mxu3 }
 0x3b3   : > { %v371_v29 = vadd.f32 %v368_v28, %v347_v27 }
 0x3b5   : > { %372 = vst.msk [vmem:[#allocation2] sm:$0xff] %vm250_vm1, %v371_v29 }
 0x3b6   : > { %v574_v31 = vld [vmem:[%s862_s4] ss:$0 sm:$0xff] }
 0x3bc   : > { %v377_v30 = vld [vmem:[#allocation2] sm:$0xff] }
 0x3bd   : > { %v382_v32 = vadd.f32 %v574_v31, %v377_v30 }
 0x3bf   : > { %383 = vst.msk [vmem:[%s227_s17] sm:$0xff] %vm250_vm1, %v382_v32 }
 0x3c0 PF: > { %s492_s12 = sshll.u32 %s657_s22, 3  ;;  %s397_s10 = sshll.u32 %s227_s17, 4  ;;  %s398_s10 = int_to_ptr.vmem [resolvable:$true] %s397_s10 }
 0x3c1   : > { %s395_s21 = scalar_lea.hbm %s863_s5, %s492_s12  ;;  %s869_s16 = sand.u32 1, %s645_s19  }
 0x3c2   : > { %s399_s15 = sshll.u32 %s395_s21, 4  ;;  %s385_s26 = scalar_lea.sflag [#allocation4], %s869_s16  ;;  %s400_s15 = int_to_ptr.hbm [resolvable:$true] %s399_s15 }
 0x3c3   : > { %s589_s27 = sshra.s32 %s400_s15, 4  ;;  %s595_s0 = scalar_lea.hbm %s863_s5, 16  ;;  %s590_s27 = int_to_ptr.hbm [resolvable:$true] %s589_s27 }
 0x3c4   : > { %s591_s7 = scalar_lea.hbm %s590_s27, 8  ;;  %p596_p5 = scmp.lt.s32.totalorder %s590_s27, %s863_s5 }
 0x3c5   : > { %p592_p1 = scmp.ne.s32.totalorder %s590_s27, %s591_s7  ;;  %p597_p6 = scmp.lt.s32.totalorder %s595_s0, %s591_s7 }
 0x3c7   : > { %p593_p2 = pnand %p592_p1, %p753_p3  ;;  %p598_p7 = por %p597_p6, %p596_p5 }
 0x3c9   : > { %p594_p4 = pneg %p593_p2 }
 0x3cb   : > { %p599_p8 = pnand %p598_p7, %p594_p4 }
 0x3cd   : > { %602 = shalt.err (!%p599_p8)
}
 0x3ce   : > { %495 = dma.vmem_to_hbm [thread:$0]  (%p753_p3), %s398_s10, 128, %s400_s15, %s385_s26  }
 0x3cf PF: > { %p501_p10 = scmp.ge.s32.totalorder %s669_s25, 2  ;;  %s411_s11 = sand.u32 1, %s641_s18  }
 0x3d0   : > { %s412_s17 = scalar_lea.sflag [#allocation4], %s411_s11 }
 0x3d1   : > { %p498_p11 = pnand %p501_p10, %p763_p9 }
 0x3d3   : > { %p499_p12 = pneg %p498_p11 }
 0x3d5   : > { %636 = dma.done.wait (%p499_p12), %s412_s17, 128  }
 0x3d6   : > { %638 = vsyncadd (%p499_p12), %s412_s17, 4294967168  ;;  %s18_s25 = sadd.s32 1, %s669_s25   ;;  %s870_s18 = smov %s645_s19 }
 0x3d7   : > { %p15_p13 = scmp.ge.s32.totalorder %s18_s25, 10   ;;  %s871_s19 = smov %s649_s20 }
 0x3d8   : > { %s872_s20 = smov %s771_s9  ;;  %s873_s21 = smov %s661_s23 }
 0x3d9   : > { %s874_s22 = smov %s665_s24  ;;  %s875_s23 = smov %s878_s28 }
 0x3da   : > { %s876_s24 = smov %s882_s29  ;;  %17 = sbr.rel (!%p15_p13) target bundleno = 7 (0x7), region = 86 }
 0x3df   :  { %418 = vsyncpa [#allocation4], 1 }
 0x3e0   :  { %420 = vsyncpa [#allocation4 + $0x1], 1 }

</bundles_post_ra>
